<compile_context>
chip_gen: v7x
topology: tpu7x:2x2x1
jax: 0.10.0
libtpu: 0.0.40
codegen_flags: <defaults>
</compile_context>

<pallas_src>
import jax
import jax.numpy as jnp
from jax.experimental import pallas as pl
from jax.experimental.pallas import tpu as pltpu

LEAKY_SLOPE = 0.01  # nn.LeakyReLU() default negative_slope


def _leaky(x):
    return jnp.where(x >= 0, x, LEAKY_SLOPE * x)


def make_dmpnn_kernel(N, E, B, H, n_layers):
    """Build the fused kernel for static sizes.

    Weight stack w_ref [8 + n_layers, H, H]:
      0 w_node(pad) 1 w_edge(pad) 2 w_init_node 3 w_init_edge
      4 w_a_node    5 w_a_msg     6 w_lin1      7 w_lin2(pad cols)
      8.. per-layer conv weights
    Bias stack b_ref [6 + n_layers, H]:
      0 b_node 1 b_edge 2 b_init 3 b_a 4 b_lin1 5 b_lin2(pad) 6.. layer biases
    Structure stack struct_ref [2E + N + 8, max(N,E)] (8-row-aligned blocks):
      rows [0,E)           cols[0,N) : S_src
      rows [E,E+N)         cols[0,E) : S_dst_T
      rows [E+N,2E+N)      cols[0,E) : M = S_src @ S_dst_T - R
      rows [2E+N,2E+N+B)   cols[0,N) : G
    Feature stack feats_ref [N+E, H]: node feats (zero-padded) then edge feats.
    """

    def kernel(feats_ref, struct_ref, w_ref, b_ref, out_ref):
        dot = lambda a, b: jnp.dot(a, b, preferred_element_type=jnp.float32)

        # --- unpack packed buffers (static slices) --------------------------
        s_src = struct_ref[0:E, 0:N]                            # [E, N]
        s_dst_t = struct_ref[E:E + N, 0:E]                      # [N, E]
        msg_op = struct_ref[E + N:2 * E + N, 0:E]               # [E, E]
        g = struct_ref[2 * E + N:2 * E + N + B, 0:N]            # [B, N]

        node_in = feats_ref[0:N, :]                             # [N, H] (zero-padded feats)
        edge_in = feats_ref[N:N + E, :]                         # [E, H]

        # --- embeddings ------------------------------------------------------
        node = dot(node_in, w_ref[0]) + b_ref[0:1, :]           # [N, H]
        edge = dot(edge_in, w_ref[1]) + b_ref[1:2, :]           # [E, H]

        # --- init hidden: LeakyReLU(cat([node[src], edge]) @ W_init + b) ------
        # split-weight form: node_src @ W_init[:H] + edge @ W_init[H:]
        node_src = dot(s_src, node)                             # [E, H]
        h0 = _leaky(dot(node_src, w_ref[2]) + dot(edge, w_ref[3]) + b_ref[2:3, :])

        # --- DMPNN message passing (unrolled; dropout = identity in eval) -----
        hidden = h0
        for l in range(n_layers):
            msg = dot(msg_op, hidden)                           # [E, H] fused gather/scatter/rev
            hidden = _leaky(h0 + dot(msg, w_ref[8 + l]) + b_ref[6 + l:7 + l, :])

        # --- node readout: W_a(cat([node, sum_incoming_hidden])) --------------
        node_msg = dot(s_dst_t, hidden)                         # [N, H]
        node_hidden = _leaky(dot(node, w_ref[4]) + dot(node_msg, w_ref[5]) + b_ref[3:4, :])

        # --- graph readout + Linears head --------------------------------------
        graph_feats = dot(g, node_hidden)                       # [B, H]
        h1 = _leaky(dot(graph_feats, w_ref[6]) + b_ref[4:5, :])
        # w_lin2 is column-padded to H (zeros beyond T), so extra lanes write 0.
        out_ref[...] = dot(h1, w_ref[7]) + b_ref[5:6, :]        # [B, H]

    return kernel


def dmpnn_forward(node_feats, edge_feats, s_src, s_dst_t, rmat, g, params):
    N = node_feats.shape[0]
    E = edge_feats.shape[0]
    B = g.shape[0]
    H = params['w_node'].shape[1]
    T = params['w_lin2'].shape[1]
    n_layers = params['w_layers'].shape[0]

    def pad_cols(x, width):
        return jnp.pad(x, ((0, 0), (0, width - x.shape[1])))

    def pad_to_hh(w):
        return jnp.pad(w, ((0, H - w.shape[0]), (0, H - w.shape[1])))

    def pad_row(b):
        b = b.reshape(1, -1)
        return jnp.pad(b, ((0, 0), (0, H - b.shape[1])))

    # --- packed feature buffer [N+E, H] -------------------------------------
    feats = jnp.concatenate(
        [pad_cols(node_feats, H), pad_cols(edge_feats, H)], axis=0)

    # --- fused message operator + packed structure buffer --------------------
    msg_op = s_src @ s_dst_t - rmat                              # [E, E]
    wid = max(N, E)
    struct = jnp.concatenate([
        pad_cols(s_src, wid),        # rows [0, E)
        pad_cols(s_dst_t, wid),      # rows [E, E+N)
        pad_cols(msg_op, wid),       # rows [E+N, 2E+N)
        pad_cols(g, wid),            # rows [2E+N, 2E+N+B)
    ], axis=0)

    # --- packed weight / bias stacks -----------------------------------------
    w_init = params['w_init']        # [2H, H]
    w_a = params['w_a']              # [2H, H]
    w_stack = jnp.stack(
        [pad_to_hh(params['w_node']),
         pad_to_hh(params['w_edge']),
         w_init[:H], w_init[H:],
         w_a[:H], w_a[H:],
         params['w_lin1'],
         pad_to_hh(params['w_lin2'])]
        + [params['w_layers'][l] for l in range(n_layers)], axis=0)   # [8+L, H, H]

    b_stack = jnp.concatenate(
        [pad_row(params['b_node']), pad_row(params['b_edge']),
         pad_row(params['b_init']), pad_row(params['b_a']),
         pad_row(params['b_lin1']), pad_row(params['b_lin2'])]
        + [pad_row(params['b_layers'][l]) for l in range(n_layers)], axis=0)  # [6+L, H]

    kernel = make_dmpnn_kernel(N, E, B, H, n_layers)
    # Everything fits in VMEM at these sizes -> single grid step, whole-array blocks.
    out_padded = pl.pallas_call(
        kernel,
        out_shape=jax.ShapeDtypeStruct((B, H), jnp.float32),
        in_specs=[pl.BlockSpec(memory_space=pltpu.MemorySpace.VMEM)] * 4,
        out_specs=pl.BlockSpec(memory_space=pltpu.MemorySpace.VMEM),
    )(feats, struct, w_stack, b_stack)
    return out_padded[:, :T]


def init_params(key, node_dim, edge_dim, hidden, conv_layers, target_dim):
    ks = jax.random.split(key, 16)
    rnd = lambda k, shape: (jax.random.normal(k, shape, jnp.float32) * 0.1)
    return dict(
        w_node=rnd(ks[0], (node_dim, hidden)), b_node=rnd(ks[1], (1, hidden)),
        w_edge=rnd(ks[2], (edge_dim, hidden)), b_edge=rnd(ks[3], (1, hidden)),
        w_init=rnd(ks[4], (2 * hidden, hidden)), b_init=rnd(ks[5], (1, hidden)),
        w_layers=rnd(ks[6], (conv_layers, hidden, hidden)),
        b_layers=rnd(ks[7], (conv_layers, 1, hidden)),
        w_a=rnd(ks[8], (2 * hidden, hidden)), b_a=rnd(ks[9], (1, hidden)),
        w_lin1=rnd(ks[10], (hidden, hidden)), b_lin1=rnd(ks[11], (1, hidden)),
        w_lin2=rnd(ks[12], (hidden, target_dim)), b_lin2=rnd(ks[13], (1, target_dim)),
    )


if __name__ == "__main__":
    # config: node_dim=16, edge_dim=8, hidden_dim=32, conv_layers=4,
    #         linear_layers=2, target_dim=2, dropout eval-mode
    N, E_half = 8, 8                 # ring graph: 8 nodes, 16 directed edges
    node_dim, edge_dim, hidden = 16, 8, 32
    conv_layers, target_dim = 4, 2
    B = 1                            # single graph in the batch

    key = jax.random.PRNGKey(0)
    k_node, k_edge, k_par = jax.random.split(key, 3)

    node_feats = jax.random.normal(k_node, (N, node_dim), jnp.float32)
    edge_feats = jax.random.normal(k_edge, (2 * E_half, edge_dim), jnp.float32)

    # directed ring graph; reverse pairs are adjacent (2i, 2i+1)
    src, dst = [], []
    for i in range(E_half):
        u, v = i, (i + 1) % N
        src += [u, v]
        dst += [v, u]
    src = jnp.array(src, jnp.int32)
    dst = jnp.array(dst, jnp.int32)
    E = 2 * E_half
    rev = jnp.arange(E, dtype=jnp.int32) ^ 1

    s_src = jax.nn.one_hot(src, N, dtype=jnp.float32)            # [E, N]
    s_dst_t = jax.nn.one_hot(dst, N, dtype=jnp.float32).T        # [N, E]
    rmat = jax.nn.one_hot(rev, E, dtype=jnp.float32)             # [E, E]
    g = jnp.ones((B, N), jnp.float32)                            # single-graph readout

    params = init_params(k_par, node_dim, edge_dim, hidden, conv_layers, target_dim)

    out = dmpnn_forward(node_feats, edge_feats, s_src, s_dst_t, rmat, g, params)
    jax.block_until_ready(out)
    assert out.shape == (B, target_dim)
    print("KERNEL_OK")
</pallas_src>

<mosaic_0001>
module attributes {stable_mosaic.version = 11 : i64} {
  func.func @kernel(%arg0: memref<24x32xf32, #tpu.memory_space<vmem>>, %arg1: memref<41x16xf32, #tpu.memory_space<vmem>>, %arg2: memref<12x32x32xf32, #tpu.memory_space<vmem>>, %arg3: memref<10x32xf32, #tpu.memory_space<vmem>>, %arg4: memref<1x32xf32, #tpu.memory_space<vmem>>) attributes {dimension_semantics = [], scalar_prefetch = 0 : i64, scratch_operands = 0 : i64, tpu.core_type = #tpu.core_type<tc>} {
    %c0 = arith.constant 0 : index
    %c0_0 = arith.constant 0 : index
    %0 = vector.load %arg1[%c0, %c0_0] : memref<41x16xf32, #tpu.memory_space<vmem>>, vector<16x8xf32>
    %c16 = arith.constant 16 : index
    %c0_1 = arith.constant 0 : index
    %1 = vector.load %arg1[%c16, %c0_1] : memref<41x16xf32, #tpu.memory_space<vmem>>, vector<8x16xf32>
    %c24 = arith.constant 24 : index
    %c0_2 = arith.constant 0 : index
    %2 = vector.load %arg1[%c24, %c0_2] : memref<41x16xf32, #tpu.memory_space<vmem>>, vector<16x16xf32>
    %c40 = arith.constant 40 : index
    %c0_3 = arith.constant 0 : index
    %3 = vector.load %arg1[%c40, %c0_3] : memref<41x16xf32, #tpu.memory_space<vmem>>, vector<1x8xf32>
    %c0_4 = arith.constant 0 : index
    %c0_5 = arith.constant 0 : index
    %4 = vector.load %arg0[%c0_4, %c0_5] : memref<24x32xf32, #tpu.memory_space<vmem>>, vector<8x32xf32>
    %c8 = arith.constant 8 : index
    %c0_6 = arith.constant 0 : index
    %5 = vector.load %arg0[%c8, %c0_6] : memref<24x32xf32, #tpu.memory_space<vmem>>, vector<16x32xf32>
    %c0_7 = arith.constant 0 : index
    %c0_8 = arith.constant 0 : index
    %c0_9 = arith.constant 0 : index
    %6 = vector.load %arg2[%c0_7, %c0_8, %c0_9] : memref<12x32x32xf32, #tpu.memory_space<vmem>>, vector<1x32x32xf32>
    %7 = vector.shape_cast %6 : vector<1x32x32xf32> to vector<32x32xf32>
    %cst = arith.constant dense<0.000000e+00> : vector<8x32xf32>
    %8 = tpu.matmul %4, %7, %cst {dimension_numbers = #tpu.dot_dimension_numbers<[1], [0], [0], [1], [0, 0, 1, 1], [], []>} : vector<8x32xf32>, vector<32x32xf32>, vector<8x32xf32> -> vector<8x32xf32>
    %c0_10 = arith.constant 0 : index
    %c0_11 = arith.constant 0 : index
    %9 = vector.load %arg3[%c0_10, %c0_11] : memref<10x32xf32, #tpu.memory_space<vmem>>, vector<1x32xf32>
    %10 = vector.broadcast %9 : vector<1x32xf32> to vector<8x32xf32>
    %11 = arith.addf %8, %10 : vector<8x32xf32>
    %c1 = arith.constant 1 : index
    %c0_12 = arith.constant 0 : index
    %c0_13 = arith.constant 0 : index
    %12 = vector.load %arg2[%c1, %c0_12, %c0_13] : memref<12x32x32xf32, #tpu.memory_space<vmem>>, vector<1x32x32xf32>
    %13 = vector.shape_cast %12 : vector<1x32x32xf32> to vector<32x32xf32>
    %cst_14 = arith.constant dense<0.000000e+00> : vector<16x32xf32>
    %14 = tpu.matmul %5, %13, %cst_14 {dimension_numbers = #tpu.dot_dimension_numbers<[1], [0], [0], [1], [0, 0, 1, 1], [], []>} : vector<16x32xf32>, vector<32x32xf32>, vector<16x32xf32> -> vector<16x32xf32>
    %c1_15 = arith.constant 1 : index
    %c0_16 = arith.constant 0 : index
    %15 = vector.load %arg3[%c1_15, %c0_16] : memref<10x32xf32, #tpu.memory_space<vmem>>, vector<1x32xf32>
    %16 = vector.broadcast %15 : vector<1x32xf32> to vector<16x32xf32>
    %17 = arith.addf %14, %16 : vector<16x32xf32>
    %cst_17 = arith.constant dense<0.000000e+00> : vector<16x32xf32>
    %18 = tpu.matmul %0, %11, %cst_17 {dimension_numbers = #tpu.dot_dimension_numbers<[1], [0], [0], [1], [0, 0, 1, 1], [], []>} : vector<16x8xf32>, vector<8x32xf32>, vector<16x32xf32> -> vector<16x32xf32>
    %c2 = arith.constant 2 : index
    %c0_18 = arith.constant 0 : index
    %c0_19 = arith.constant 0 : index
    %19 = vector.load %arg2[%c2, %c0_18, %c0_19] : memref<12x32x32xf32, #tpu.memory_space<vmem>>, vector<1x32x32xf32>
    %20 = vector.shape_cast %19 : vector<1x32x32xf32> to vector<32x32xf32>
    %cst_20 = arith.constant dense<0.000000e+00> : vector<16x32xf32>
    %21 = tpu.matmul %18, %20, %cst_20 {dimension_numbers = #tpu.dot_dimension_numbers<[1], [0], [0], [1], [0, 0, 1, 1], [], []>} : vector<16x32xf32>, vector<32x32xf32>, vector<16x32xf32> -> vector<16x32xf32>
    %c3 = arith.constant 3 : index
    %c0_21 = arith.constant 0 : index
    %c0_22 = arith.constant 0 : index
    %22 = vector.load %arg2[%c3, %c0_21, %c0_22] : memref<12x32x32xf32, #tpu.memory_space<vmem>>, vector<1x32x32xf32>
    %23 = vector.shape_cast %22 : vector<1x32x32xf32> to vector<32x32xf32>
    %cst_23 = arith.constant dense<0.000000e+00> : vector<16x32xf32>
    %24 = tpu.matmul %17, %23, %cst_23 {dimension_numbers = #tpu.dot_dimension_numbers<[1], [0], [0], [1], [0, 0, 1, 1], [], []>} : vector<16x32xf32>, vector<32x32xf32>, vector<16x32xf32> -> vector<16x32xf32>
    %25 = arith.addf %21, %24 : vector<16x32xf32>
    %c2_24 = arith.constant 2 : index
    %c0_25 = arith.constant 0 : index
    %26 = vector.load %arg3[%c2_24, %c0_25] : memref<10x32xf32, #tpu.memory_space<vmem>>, vector<1x32xf32>
    %27 = vector.broadcast %26 : vector<1x32xf32> to vector<16x32xf32>
    %28 = arith.addf %25, %27 : vector<16x32xf32>
    %cst_26 = arith.constant 0.000000e+00 : f32
    %29 = vector.broadcast %cst_26 : f32 to vector<16x32xf32>
    %30 = arith.cmpf oge, %28, %29 : vector<16x32xf32>
    %cst_27 = arith.constant 0.00999999977 : f32
    %31 = vector.broadcast %cst_27 : f32 to vector<16x32xf32>
    %32 = arith.mulf %31, %28 : vector<16x32xf32>
    %33 = arith.select %30, %28, %32 : vector<16x32xi1>, vector<16x32xf32>
    %cst_28 = arith.constant dense<0.000000e+00> : vector<16x32xf32>
    %34 = tpu.matmul %2, %33, %cst_28 {dimension_numbers = #tpu.dot_dimension_numbers<[1], [0], [0], [1], [0, 0, 1, 1], [], []>} : vector<16x16xf32>, vector<16x32xf32>, vector<16x32xf32> -> vector<16x32xf32>
    %c8_29 = arith.constant 8 : index
    %c0_30 = arith.constant 0 : index
    %c0_31 = arith.constant 0 : index
    %35 = vector.load %arg2[%c8_29, %c0_30, %c0_31] : memref<12x32x32xf32, #tpu.memory_space<vmem>>, vector<1x32x32xf32>
    %36 = vector.shape_cast %35 : vector<1x32x32xf32> to vector<32x32xf32>
    %cst_32 = arith.constant dense<0.000000e+00> : vector<16x32xf32>
    %37 = tpu.matmul %34, %36, %cst_32 {dimension_numbers = #tpu.dot_dimension_numbers<[1], [0], [0], [1], [0, 0, 1, 1], [], []>} : vector<16x32xf32>, vector<32x32xf32>, vector<16x32xf32> -> vector<16x32xf32>
    %38 = arith.addf %33, %37 : vector<16x32xf32>
    %c6 = arith.constant 6 : index
    %c0_33 = arith.constant 0 : index
    %39 = vector.load %arg3[%c6, %c0_33] : memref<10x32xf32, #tpu.memory_space<vmem>>, vector<1x32xf32>
    %40 = vector.broadcast %39 : vector<1x32xf32> to vector<16x32xf32>
    %41 = arith.addf %38, %40 : vector<16x32xf32>
    %cst_34 = arith.constant 0.000000e+00 : f32
    %42 = vector.broadcast %cst_34 : f32 to vector<16x32xf32>
    %43 = arith.cmpf oge, %41, %42 : vector<16x32xf32>
    %cst_35 = arith.constant 0.00999999977 : f32
    %44 = vector.broadcast %cst_35 : f32 to vector<16x32xf32>
    %45 = arith.mulf %44, %41 : vector<16x32xf32>
    %46 = arith.select %43, %41, %45 : vector<16x32xi1>, vector<16x32xf32>
    %cst_36 = arith.constant dense<0.000000e+00> : vector<16x32xf32>
    %47 = tpu.matmul %2, %46, %cst_36 {dimension_numbers = #tpu.dot_dimension_numbers<[1], [0], [0], [1], [0, 0, 1, 1], [], []>} : vector<16x16xf32>, vector<16x32xf32>, vector<16x32xf32> -> vector<16x32xf32>
    %c9 = arith.constant 9 : index
    %c0_37 = arith.constant 0 : index
    %c0_38 = arith.constant 0 : index
    %48 = vector.load %arg2[%c9, %c0_37, %c0_38] : memref<12x32x32xf32, #tpu.memory_space<vmem>>, vector<1x32x32xf32>
    %49 = vector.shape_cast %48 : vector<1x32x32xf32> to vector<32x32xf32>
    %cst_39 = arith.constant dense<0.000000e+00> : vector<16x32xf32>
    %50 = tpu.matmul %47, %49, %cst_39 {dimension_numbers = #tpu.dot_dimension_numbers<[1], [0], [0], [1], [0, 0, 1, 1], [], []>} : vector<16x32xf32>, vector<32x32xf32>, vector<16x32xf32> -> vector<16x32xf32>
    %51 = arith.addf %33, %50 : vector<16x32xf32>
    %c7 = arith.constant 7 : index
    %c0_40 = arith.constant 0 : index
    %52 = vector.load %arg3[%c7, %c0_40] : memref<10x32xf32, #tpu.memory_space<vmem>>, vector<1x32xf32>
    %53 = vector.broadcast %52 : vector<1x32xf32> to vector<16x32xf32>
    %54 = arith.addf %51, %53 : vector<16x32xf32>
    %cst_41 = arith.constant 0.000000e+00 : f32
    %55 = vector.broadcast %cst_41 : f32 to vector<16x32xf32>
    %56 = arith.cmpf oge, %54, %55 : vector<16x32xf32>
    %cst_42 = arith.constant 0.00999999977 : f32
    %57 = vector.broadcast %cst_42 : f32 to vector<16x32xf32>
    %58 = arith.mulf %57, %54 : vector<16x32xf32>
    %59 = arith.select %56, %54, %58 : vector<16x32xi1>, vector<16x32xf32>
    %cst_43 = arith.constant dense<0.000000e+00> : vector<16x32xf32>
    %60 = tpu.matmul %2, %59, %cst_43 {dimension_numbers = #tpu.dot_dimension_numbers<[1], [0], [0], [1], [0, 0, 1, 1], [], []>} : vector<16x16xf32>, vector<16x32xf32>, vector<16x32xf32> -> vector<16x32xf32>
    %c10 = arith.constant 10 : index
    %c0_44 = arith.constant 0 : index
    %c0_45 = arith.constant 0 : index
    %61 = vector.load %arg2[%c10, %c0_44, %c0_45] : memref<12x32x32xf32, #tpu.memory_space<vmem>>, vector<1x32x32xf32>
    %62 = vector.shape_cast %61 : vector<1x32x32xf32> to vector<32x32xf32>
    %cst_46 = arith.constant dense<0.000000e+00> : vector<16x32xf32>
    %63 = tpu.matmul %60, %62, %cst_46 {dimension_numbers = #tpu.dot_dimension_numbers<[1], [0], [0], [1], [0, 0, 1, 1], [], []>} : vector<16x32xf32>, vector<32x32xf32>, vector<16x32xf32> -> vector<16x32xf32>
    %64 = arith.addf %33, %63 : vector<16x32xf32>
    %c8_47 = arith.constant 8 : index
    %c0_48 = arith.constant 0 : index
    %65 = vector.load %arg3[%c8_47, %c0_48] : memref<10x32xf32, #tpu.memory_space<vmem>>, vector<1x32xf32>
    %66 = vector.broadcast %65 : vector<1x32xf32> to vector<16x32xf32>
    %67 = arith.addf %64, %66 : vector<16x32xf32>
    %cst_49 = arith.constant 0.000000e+00 : f32
    %68 = vector.broadcast %cst_49 : f32 to vector<16x32xf32>
    %69 = arith.cmpf oge, %67, %68 : vector<16x32xf32>
    %cst_50 = arith.constant 0.00999999977 : f32
    %70 = vector.broadcast %cst_50 : f32 to vector<16x32xf32>
    %71 = arith.mulf %70, %67 : vector<16x32xf32>
    %72 = arith.select %69, %67, %71 : vector<16x32xi1>, vector<16x32xf32>
    %cst_51 = arith.constant dense<0.000000e+00> : vector<16x32xf32>
    %73 = tpu.matmul %2, %72, %cst_51 {dimension_numbers = #tpu.dot_dimension_numbers<[1], [0], [0], [1], [0, 0, 1, 1], [], []>} : vector<16x16xf32>, vector<16x32xf32>, vector<16x32xf32> -> vector<16x32xf32>
    %c11 = arith.constant 11 : index
    %c0_52 = arith.constant 0 : index
    %c0_53 = arith.constant 0 : index
    %74 = vector.load %arg2[%c11, %c0_52, %c0_53] : memref<12x32x32xf32, #tpu.memory_space<vmem>>, vector<1x32x32xf32>
    %75 = vector.shape_cast %74 : vector<1x32x32xf32> to vector<32x32xf32>
    %cst_54 = arith.constant dense<0.000000e+00> : vector<16x32xf32>
    %76 = tpu.matmul %73, %75, %cst_54 {dimension_numbers = #tpu.dot_dimension_numbers<[1], [0], [0], [1], [0, 0, 1, 1], [], []>} : vector<16x32xf32>, vector<32x32xf32>, vector<16x32xf32> -> vector<16x32xf32>
    %77 = arith.addf %33, %76 : vector<16x32xf32>
    %c9_55 = arith.constant 9 : index
    %c0_56 = arith.constant 0 : index
    %78 = vector.load %arg3[%c9_55, %c0_56] : memref<10x32xf32, #tpu.memory_space<vmem>>, vector<1x32xf32>
    %79 = vector.broadcast %78 : vector<1x32xf32> to vector<16x32xf32>
    %80 = arith.addf %77, %79 : vector<16x32xf32>
    %cst_57 = arith.constant 0.000000e+00 : f32
    %81 = vector.broadcast %cst_57 : f32 to vector<16x32xf32>
    %82 = arith.cmpf oge, %80, %81 : vector<16x32xf32>
    %cst_58 = arith.constant 0.00999999977 : f32
    %83 = vector.broadcast %cst_58 : f32 to vector<16x32xf32>
    %84 = arith.mulf %83, %80 : vector<16x32xf32>
    %85 = arith.select %82, %80, %84 : vector<16x32xi1>, vector<16x32xf32>
    %cst_59 = arith.constant dense<0.000000e+00> : vector<8x32xf32>
    %86 = tpu.matmul %1, %85, %cst_59 {dimension_numbers = #tpu.dot_dimension_numbers<[1], [0], [0], [1], [0, 0, 1, 1], [], []>} : vector<8x16xf32>, vector<16x32xf32>, vector<8x32xf32> -> vector<8x32xf32>
    %c4 = arith.constant 4 : index
    %c0_60 = arith.constant 0 : index
    %c0_61 = arith.constant 0 : index
    %87 = vector.load %arg2[%c4, %c0_60, %c0_61] : memref<12x32x32xf32, #tpu.memory_space<vmem>>, vector<1x32x32xf32>
    %88 = vector.shape_cast %87 : vector<1x32x32xf32> to vector<32x32xf32>
    %cst_62 = arith.constant dense<0.000000e+00> : vector<8x32xf32>
    %89 = tpu.matmul %11, %88, %cst_62 {dimension_numbers = #tpu.dot_dimension_numbers<[1], [0], [0], [1], [0, 0, 1, 1], [], []>} : vector<8x32xf32>, vector<32x32xf32>, vector<8x32xf32> -> vector<8x32xf32>
    %c5 = arith.constant 5 : index
    %c0_63 = arith.constant 0 : index
    %c0_64 = arith.constant 0 : index
    %90 = vector.load %arg2[%c5, %c0_63, %c0_64] : memref<12x32x32xf32, #tpu.memory_space<vmem>>, vector<1x32x32xf32>
    %91 = vector.shape_cast %90 : vector<1x32x32xf32> to vector<32x32xf32>
    %cst_65 = arith.constant dense<0.000000e+00> : vector<8x32xf32>
    %92 = tpu.matmul %86, %91, %cst_65 {dimension_numbers = #tpu.dot_dimension_numbers<[1], [0], [0], [1], [0, 0, 1, 1], [], []>} : vector<8x32xf32>, vector<32x32xf32>, vector<8x32xf32> -> vector<8x32xf32>
    %93 = arith.addf %89, %92 : vector<8x32xf32>
    %c3_66 = arith.constant 3 : index
    %c0_67 = arith.constant 0 : index
    %94 = vector.load %arg3[%c3_66, %c0_67] : memref<10x32xf32, #tpu.memory_space<vmem>>, vector<1x32xf32>
    %95 = vector.broadcast %94 : vector<1x32xf32> to vector<8x32xf32>
    %96 = arith.addf %93, %95 : vector<8x32xf32>
    %cst_68 = arith.constant 0.000000e+00 : f32
    %97 = vector.broadcast %cst_68 : f32 to vector<8x32xf32>
    %98 = arith.cmpf oge, %96, %97 : vector<8x32xf32>
    %cst_69 = arith.constant 0.00999999977 : f32
    %99 = vector.broadcast %cst_69 : f32 to vector<8x32xf32>
    %100 = arith.mulf %99, %96 : vector<8x32xf32>
    %101 = arith.select %98, %96, %100 : vector<8x32xi1>, vector<8x32xf32>
    %cst_70 = arith.constant dense<0.000000e+00> : vector<1x32xf32>
    %102 = tpu.matmul %3, %101, %cst_70 {dimension_numbers = #tpu.dot_dimension_numbers<[1], [0], [0], [1], [0, 0, 1, 1], [], []>} : vector<1x8xf32>, vector<8x32xf32>, vector<1x32xf32> -> vector<1x32xf32>
    %c6_71 = arith.constant 6 : index
    %c0_72 = arith.constant 0 : index
    %c0_73 = arith.constant 0 : index
    %103 = vector.load %arg2[%c6_71, %c0_72, %c0_73] : memref<12x32x32xf32, #tpu.memory_space<vmem>>, vector<1x32x32xf32>
    %104 = vector.shape_cast %103 : vector<1x32x32xf32> to vector<32x32xf32>
    %cst_74 = arith.constant dense<0.000000e+00> : vector<1x32xf32>
    %105 = tpu.matmul %102, %104, %cst_74 {dimension_numbers = #tpu.dot_dimension_numbers<[1], [0], [0], [1], [0, 0, 1, 1], [], []>} : vector<1x32xf32>, vector<32x32xf32>, vector<1x32xf32> -> vector<1x32xf32>
    %c4_75 = arith.constant 4 : index
    %c0_76 = arith.constant 0 : index
    %106 = vector.load %arg3[%c4_75, %c0_76] : memref<10x32xf32, #tpu.memory_space<vmem>>, vector<1x32xf32>
    %107 = arith.addf %105, %106 : vector<1x32xf32>
    %cst_77 = arith.constant 0.000000e+00 : f32
    %108 = vector.broadcast %cst_77 : f32 to vector<1x32xf32>
    %109 = arith.cmpf oge, %107, %108 : vector<1x32xf32>
    %cst_78 = arith.constant 0.00999999977 : f32
    %110 = vector.broadcast %cst_78 : f32 to vector<1x32xf32>
    %111 = arith.mulf %110, %107 : vector<1x32xf32>
    %112 = arith.select %109, %107, %111 : vector<1x32xi1>, vector<1x32xf32>
    %c7_79 = arith.constant 7 : index
    %c0_80 = arith.constant 0 : index
    %c0_81 = arith.constant 0 : index
    %113 = vector.load %arg2[%c7_79, %c0_80, %c0_81] : memref<12x32x32xf32, #tpu.memory_space<vmem>>, vector<1x32x32xf32>
    %114 = vector.shape_cast %113 : vector<1x32x32xf32> to vector<32x32xf32>
    %cst_82 = arith.constant dense<0.000000e+00> : vector<1x32xf32>
    %115 = tpu.matmul %112, %114, %cst_82 {dimension_numbers = #tpu.dot_dimension_numbers<[1], [0], [0], [1], [0, 0, 1, 1], [], []>} : vector<1x32xf32>, vector<32x32xf32>, vector<1x32xf32> -> vector<1x32xf32>
    %c5_83 = arith.constant 5 : index
    %c0_84 = arith.constant 0 : index
    %116 = vector.load %arg3[%c5_83, %c0_84] : memref<10x32xf32, #tpu.memory_space<vmem>>, vector<1x32xf32>
    %117 = arith.addf %115, %116 : vector<1x32xf32>
    %c0_85 = arith.constant 0 : index
    %c0_86 = arith.constant 0 : index
    %118 = vector.load %arg4[%c0_85, %c0_86] : memref<1x32xf32, #tpu.memory_space<vmem>>, vector<1x32xf32>
    tpu.vector_store %arg4[%c0_85, %c0_86], %117 {strides = array<i32>} : memref<1x32xf32, #tpu.memory_space<vmem>>, vector<1x32xf32>,
    return
  }
}

</mosaic_0001>

<bundles_post_ra>
// kernel: tpu_custom_call.1
= control target key start
LH: loop header
LB: loop body
LE: loop exit
PB: predicated region body
PF: predicated region fallthrough
CT: control target
= control target key end

     0   :  { %9 = vsyncpa [#allocation3], 0  ;;  %s2352_s0 = inlined_call_operand.vmem [shape: f32[24,32], index: 0, kind: input, shape index: {}]   ;;  %s2353_s1 = inlined_call_operand.vmem [shape: f32[41,16], index: 1, kind: input, shape index: {}]   ;;  %s2354_s2 = inlined_call_operand.hbm [shape: f32[12,32,32], index: 2, kind: input, shape index: {}]   ;;  %s2355_s3 = inlined_call_operand.vmem [shape: f32[10,32], index: 3, kind: input, shape index: {}]   ;;  %s2356_s4 = inlined_call_operand.hbm [shape: f32[1,32], index: 4, kind: output, shape index: {}]  }
   0x1   :  { %10 = vsyncpa [#allocation4], 0  ;;  %s2151_s15 = smov [#allocation2]   ;;  %s2103_s19 = scalar_lea.hbm %s2354_s2, 6144 }
   0x2   :  { %s20_s16 = sshll.u32 %s2151_s15, 4  ;;  %p2104_p0 = scmp.ne.s32.totalorder %s2354_s2, %s2103_s19  ;;  %s21_s16 = int_to_ptr.vmem [resolvable:$true] %s20_s16 }
   0x3   :  { %p2107_p1 = scmp.lt.u32.totalorder %s2103_s19, %s2354_s2 }
   0x5   :  { %p2109_p2 = pnand %p2107_p1, %p2104_p0 }
   0x7   :  { %2112 = shalt.err (!%p2109_p2)
}
   0x8   :  { %s2113_s24 = scalar_lea.vmem %s21_s16, 6144  ;;  %p2118_p4 = scmp.lt.s32.totalorder %s21_s16, %s21_s16 }
   0x9   :  { %p2114_p3 = scmp.ne.s32.totalorder %s21_s16, %s2113_s24  ;;  %p2119_p5 = scmp.lt.s32.totalorder %s2113_s24, %s2113_s24 }
   0xb   :  { %p2120_p6 = por %p2119_p5, %p2118_p4 }
   0xd   :  { %p2121_p7 = pnand %p2120_p6, %p2114_p3 }
   0xf   :  { %2124 = shalt.err (!%p2121_p7)
}
  0x10   :  { %s2152_s25 = smov 128   ;;  %s2153_s26 = smov 8  }
  0x11   :  { %26 = dma.hbm_to_vmem [thread:$0]  %s2354_s2, 6144, %s21_s16, [#allocation3], %s2152_s25, %s2152_s25, %s2153_s26  }
  0x12   :  { %2147 = dma.done.wait [#allocation3], 6144  }
  0x13   :  { %2148 = vsyncadd [#allocation3], 4294961152  ;;  %v2154_v0 = vmov 0.0|0.0   ;;  %vm2155_vm0 = vmmov 0   ;;  %v2156_v1 = vmov 0.0   ;;  %v41_v2 = vld [vmem:[#allocation2] sm:$0xff] }
  0x14   :  { %1989 = vmatprep.subr.bf16.mxu0 %v2154_v0  ;;  %1820 = vmatprep.mubr.msk.f32.mxu0 %vm2155_vm0, %v2156_v1  ;;  %v42_v3 = vld [vmem:[#allocation2 + $0x8] sm:$0xff]  ;;  %v43_v4 = vld [vmem:[#allocation2 + $0x10] sm:$0xff]  ;;  %v44_v6 = vld [vmem:[#allocation2 + $0x18] sm:$0xff]  ;;  %vm50_vm1 = vcmask 261120   ;;  %vm215_vm2 = vcmask 64512   ;;  %vm482_vm3 = vcmask 130048  }
  0x15   :  { %v1990_v5 = vpack.c.bf16 %v42_v3, %v41_v2  ;;  %v125_v7 = vld [vmem:[#allocation2 + $0x20] sm:$0xff]  ;;  %v126_v8 = vld [vmem:[#allocation2 + $0x28] sm:$0xff]  ;;  %v127_v9 = vld [vmem:[#allocation2 + $0x30] sm:$0xff]  ;;  %v1993_v11 = vpack.c.bf16 %v44_v6, %v43_v4  ;;  %s2157_s10 = smov [#allocation5]  }
  0x16   :  { %v128_v10 = vld [vmem:[#allocation2 + $0x38] sm:$0xff]  ;;  %v1995_v12 = vpack.c.bf16 %v126_v8, %v125_v7  ;;  %v39_v14 = vld [vmem:[%s2352_s0 + $0x8] sm:$0xff]  ;;  %v38_v15 = vld [vmem:[%s2352_s0] sm:$0xff]  ;;  %s1673_s11 = sshll.u32 %s2157_s10, 4  ;;  %s1674_s11 = int_to_ptr.vmem [resolvable:$true] %s1673_s11 }
  0x17   :  { %1991 = vmatpush3.bf16.msra.mxu0 %v1990_v5  ;;  %v1999_v13 = vpack.c.bf16 %v128_v10, %v127_v9  ;;  %1831 = vmatprep.mubr.msk.f32.mxu1 %vm50_vm1, %v39_v14  ;;  %v40_v16 = vld [vmem:[%s2352_s0 + $0x10] sm:$0xff]  ;;  %v32_v17 = vld [vmem:[%s2353_s1] sm:$0xff]  ;;  %v304_v19 = vld [vmem:[#allocation2 + $0x68] sm:$0xff]  ;;  %s2125_s12 = scalar_lea.vmem %s1674_s11, 16  ;;  %s2129_s13 = scalar_lea.vmem %s1674_s11, 32 }
  0x18   :  { %1992 = vmatprep.subr.bf16.mxu0 %v2154_v0  ;;  %1996 = vmatprep.subr.bf16.mxu1 %v1995_v12  ;;  %v303_v18 = vld [vmem:[#allocation2 + $0x60] sm:$0xff]  ;;  %v305_v21 = vld [vmem:[#allocation2 + $0x70] sm:$0xff]  ;;  %v306_v22 = vld [vmem:[#allocation2 + $0x78] sm:$0xff]  ;;  %p2126_p8 = scmp.ne.s32.totalorder %s1674_s11, %s2125_s12  ;;  %p2130_p9 = scmp.lt.s32.totalorder %s1674_s11, %s1674_s11 }
  0x19   :  { %1998 = vmatpush3.bf16.msra.mxu1 %v1995_v12  ;;  %v2003_v20 = vpack.c.bf16 %v304_v19, %v303_v18  ;;  %v2007_v23 = vpack.c.bf16 %v306_v22, %v305_v21  ;;  %v298_v24 = vld [vmem:[#allocation2 + $0x40] sm:$0xff]  ;;  %v299_v25 = vld [vmem:[#allocation2 + $0x48] sm:$0xff]  ;;  %v300_v34 = vld [vmem:[#allocation2 + $0x50] sm:$0xff]  ;;  %p2131_p10 = scmp.lt.s32.totalorder %s2129_s13, %s2125_s12 }
  0x1a   :  { %2000 = vmatprep.subr.bf16.mxu1 %v1999_v13  ;;  %v2011_v26 = vpack.c.bf16 %v299_v25, %v298_v24  ;;  %v1682_v27 = vld [vmem:[%s2355_s3] ss:$0 sm:$0xff]  ;;  %v1684_v31 = vld [vmem:[%s2355_s3 + $0x1] ss:$0 sm:$0xff]  ;;  %v33_v32 = vld [vmem:[%s2353_s1 + $0x8] sm:$0xff] }
  0x1b   :  { %1994 = vmatpush3.bf16.msra.mxu0 %v1993_v11  ;;  %v301_v35 = vld [vmem:[#allocation2 + $0x58] sm:$0xff]  ;;  %v1693_v43 = vld [vmem:[%s2355_s3 + $0x2] ss:$0 sm:$0xff]  ;;  %v566_v51 = vld [vmem:[#allocation2 + $0x108] sm:$0xff]  ;;  %p2132_p11 = por %p2131_p10, %p2130_p9 }
  0x1c   :  { %v2015_v39 = vpack.c.bf16 %v301_v35, %v300_v34  ;;  %v2236_v42 = vld [vmem:[%s2353_s1 + $0x18] sm:$0xff]  ;;  %v565_v50 = vld [vmem:[#allocation2 + $0x100] sm:$0xff]  ;;  %v567_v56 = vld [vmem:[#allocation2 + $0x110] sm:$0xff] }
  0x1d   :  { %2002 = vmatpush3.bf16.msra.mxu1 %v1999_v13  ;;  %v2023_v55 = vpack.c.bf16 %v566_v51, %v565_v50  ;;  %v568_v57 = vld [vmem:[#allocation2 + $0x118] sm:$0xff]  ;;  %v2252_v58 = vld [vmem:[%s2353_s1 + $0x20] sm:$0xff]  ;;  %v742_v63 = vld [vmem:[#allocation2 + $0x128] sm:$0xff]  ;;  %p2133_p12 = pnand %p2132_p11, %p2126_p8 }
  0x1e   :  { %1821 = vmatmul.mubr.msk.f32.vlgmr.msra.gmra.mrb[0].mxu0 %vm50_vm1, %v38_v15  ;;  %2004 = vmatprep.subr.bf16.mxu1 %v2003_v20  ;;  %v2027_v59 = vpack.c.bf16 %v568_v57, %v567_v56  ;;  %v741_v62 = vld [vmem:[#allocation2 + $0x120] sm:$0xff]  ;;  %v743_v2 = vld [vmem:[#allocation2 + $0x130] sm:$0xff]  ;;  %v744_v4 = vld [vmem:[#allocation2 + $0x138] sm:$0xff] }
  0x1f   :  { %1836 = vmatprep.mubr.msk.f32.mxu0 %vm215_vm2, %v32_v17  ;;  %v2035_v3 = vpack.c.bf16 %v742_v63, %v741_v62  ;;  %v2039_v5 = vpack.c.bf16 %v744_v4, %v743_v2  ;;  %v1698_v7 = vld [vmem:[%s2355_s3 + $0x6] ss:$0 sm:$0xff]  ;;  %v1703_v21 = vld [vmem:[%s2355_s3 + $0x7] ss:$0 sm:$0xff]  ;;  %v1094_v51 = vld [vmem:[#allocation2 + $0x168] sm:$0xff] }
  0x20   :  { %1832 = vmatmul.mubr.msk.f32.vlgmr.msra.gmra.mrb[0].mxu1 %vm50_vm1, %v40_v16  ;;  %v1093_v50 = vld [vmem:[#allocation2 + $0x160] sm:$0xff]  ;;  %v1268_v63 = vld [vmem:[#allocation2 + $0x88] sm:$0xff] }
  0x21   :  { %2006 = vmatpush3.bf16.msra.mxu1 %v2003_v20  ;;  %v2059_v57 = vpack.c.bf16 %v1094_v51, %v1093_v50  ;;  %v1267_v62 = vld [vmem:[#allocation2 + $0x80] sm:$0xff] }
  0x22   :  { %2008 = vmatprep.subr.bf16.mxu1 %v2007_v23  ;;  %v1509_v50 = vld [vmem:[%s2355_s3 + $0x4] sm:$0x1] }
  0x25   :  { %2010 = vmatpush3.bf16.msra.mxu1 %v2007_v23 }
  0x26   :  { %2012 = vmatprep.subr.bf16.mxu1 %v2011_v26 }
  0xf1   :  { %v120_v28 = vpop.f32.mrb[0].mxu0 }
  0xf2   :  { %v2218_v29 = vadd.f32 %v1682_v27, %v120_v28  ;;  %v1822_v30 = vpop.f32.mrb[1].mxu0 }
  0xf3   :  { %v1833_v33 = vpop.f32.mrb[0].mxu1  ;;  %v917_v30 = vld [vmem:[#allocation2 + $0x140] sm:$0xff] }
  0xf4   :  { %1834 = vmatprep.subr.mxu0 %v2218_v29  ;;  %v212_v36 = vadd.f32 %v1833_v33, %v1684_v31  ;;  %v206_v37 = vpop.f32.mrb[1].mxu1 }
  0xf5   :  { %1835 = vmatpush3.msra.mxu0 %v2218_v29  ;;  %v207_v38 = vadd.f32 %v1684_v31, %v206_v37  ;;  %v918_v31 = vld [vmem:[#allocation2 + $0x148] sm:$0xff]  ;;  %v920_v37 = vld [vmem:[#allocation2 + $0x158] sm:$0xff] }
  0xf6   :  { %1837 = vmatmul.mubr.msk.f32.vlgmr.msra.gmra.mrb[2].mxu0 %vm215_vm2, %v33_v32  ;;  %v2047_v35 = vpack.c.bf16 %v918_v31, %v917_v30  ;;  %v1507_v30 = vld [vmem:[#allocation2 + $0xd0] sm:$0xff] }
  0xf7   :  { %1847 = vmatprep.mubr.msk.f32.mxu1 %vm50_vm1, %v207_v38  ;;  %1865 = vmatprep.mubr.msk.f32.mxu0 %vm482_vm3, %v2236_v42 }
  0xf8   :  { %1848 = vmatmul.mubr.msk.f32.vlgmr.msra.gmra.mrb[2].mxu1 %vm50_vm1, %v212_v36  ;;  %v919_v36 = vld [vmem:[#allocation2 + $0x150] sm:$0xff] }
  0xf9   :  { %2014 = vmatpush3.bf16.msra.mxu1 %v2011_v26  ;;  %v2051_v38 = vpack.c.bf16 %v920_v37, %v919_v36 }
  0xfa   :  { %2016 = vmatprep.subr.bf16.mxu1 %v2015_v39 }
  0xfd   :  { %2018 = vmatpush3.bf16.msra.mxu1 %v2015_v39 }
  0xfe   :  { %2036 = vmatprep.subr.bf16.mxu1 %v2035_v3 }
 0x1c9   :  { %v1838_v40 = vpop.f32.mrb[2].mxu0 }
 0x1ca   :  { %v288_v41 = vpop.f32.mrb[3].mxu0 }
 0x1cb   :  { %1858 = vmatprep.mubr.msk.f32.mxu1 %vm50_vm1, %v288_v41 }
 0x1cc   :  { %1859 = vmatmul.mubr.msk.f32.vlgmr.msra.gmra.mrb[2].mxu1 %vm50_vm1, %v1838_v40 }
 0x1cd   :  { %2038 = vmatpush3.bf16.msra.mxu1 %v2035_v3  ;;  %v2077_v3 = vpack.c.bf16 %v1268_v63, %v1267_v62 }
 0x1ce   :  { %2040 = vmatprep.subr.bf16.mxu1 %v2039_v5 }
 0x1d1   :  { %2042 = vmatpush3.bf16.msra.mxu1 %v2039_v5  ;;  %v1269_v5 = vld [vmem:[#allocation2 + $0x90] sm:$0xff] }
 0x29f   :  { %v1860_v44 = vpop.f32.mrb[2].mxu1 }
 0x2a0   :  { %v475_v45 = vadd.f32 %v1860_v44, %v1693_v43  ;;  %v460_v46 = vpop.f32.mrb[3].mxu1 }
 0x2a1   :  { %v474_v47 = vadd.f32 %v1693_v43, %v460_v46 }
 0x2a2   :  { %vm477_vm4 = vcmp.ge.f32.partialorder %v475_v45, 0.0  ;;  %v479_v48 = vmul.f32 0.01, %v475_v45 }
 0x2a3   :  { %vm476_vm5 = vcmp.ge.f32.partialorder %v474_v47, 0.0  ;;  %v478_v49 = vmul.f32 0.01, %v474_v47 }
 0x2a4   :  { %v2243_v52 = vsel %vm477_vm4, %v475_v45, %v479_v48 }
 0x2a5   :  { %v2245_v53 = vsel %vm476_vm5, %v474_v47, %v478_v49 }
 0x2a6   :  { %v2019_v54 = vpack.c.bf16 %v2243_v52, %v2245_v53 }
 0x2a8   :  { %2020 = vmatprep.subr.bf16.mxu0 %v2019_v54 }
 0x2a9   :  { %2022 = vmatpush3.bf16.msra.mxu0 %v2019_v54 }
 0x2aa   :  { %2024 = vmatprep.subr.bf16.mxu0 %v2023_v55 }
 0x2ac   :  { %1866 = vmatmul.mubr.msk.f32.vlgmr.msra.gmra.mrb[4].mxu0 %vm482_vm3, %v2252_v58 }
 0x2ad   :  { %2026 = vmatpush3.bf16.msra.mxu0 %v2023_v55 }
 0x2ae   :  { %2028 = vmatprep.subr.bf16.mxu0 %v2027_v59 }
 0x2b1   :  { %2030 = vmatpush3.bf16.msra.mxu0 %v2027_v59  ;;  %v1095_v59 = vld [vmem:[#allocation2 + $0x170] sm:$0xff] }
 0x37f   :  { %v1867_v60 = vpop.f32.mrb[4].mxu0 }
 0x380   :  { %v555_v61 = vpop.f32.mrb[5].mxu0 }
 0x381   :  { %1876 = vmatprep.mubr.msk.f32.mxu0 %vm50_vm1, %v555_v61 }
 0x382   :  { %1877 = vmatmul.mubr.msk.f32.vlgmr.msra.gmra.mrb[6].mxu0 %vm50_vm1, %v1867_v60  ;;  %v1096_v60 = vld [vmem:[#allocation2 + $0x178] sm:$0xff] }
 0x383   :  { %1883 = vmatprep.mubr.msk.f32.mxu0 %vm482_vm3, %v2236_v42  ;;  %v2063_v61 = vpack.c.bf16 %v1096_v60, %v1095_v59 }
 0x455   :  { %v1878_v6 = vpop.f32.mrb[6].mxu0 }
 0x456   :  { %v651_v8 = vadd.f32 %v1878_v6, %v2243_v52  ;;  %v641_v9 = vpop.f32.mrb[7].mxu0  ;;  %v1270_v6 = vld [vmem:[#allocation2 + $0x98] sm:$0xff] }
 0x457   :  { %v650_v10 = vadd.f32 %v641_v9, %v2245_v53 }
 0x458   :  { %v658_v11 = vadd.f32 %v1698_v7, %v651_v8  ;;  %v1713_v8 = vld [vmem:[%s2355_s3 + $0x9] ss:$0 sm:$0xff] }
 0x459   :  { %v657_v12 = vadd.f32 %v1698_v7, %v650_v10  ;;  %v2080_v7 = vpack.c.bf16 %v1270_v6, %v1269_v5 }
 0x45a   :  { %vm660_vm6 = vcmp.ge.f32.partialorder %v658_v11, 0.0  ;;  %v662_v13 = vmul.f32 0.01, %v658_v11 }
 0x45b   :  { %vm659_vm7 = vcmp.ge.f32.partialorder %v657_v12, 0.0  ;;  %v661_v14 = vmul.f32 0.01, %v657_v12 }
 0x45c   :  { %v664_v15 = vsel %vm660_vm6, %v658_v11, %v662_v13 }
 0x45d   :  { %v663_v16 = vsel %vm659_vm7, %v657_v12, %v661_v14 }
 0x45e   :  { %v2031_v17 = vpack.c.bf16 %v664_v15, %v663_v16 }
 0x460   :  { %2032 = vmatprep.subr.bf16.mxu0 %v2031_v17 }
 0x461   :  { %2034 = vmatpush3.bf16.msra.mxu0 %v2031_v17 }
 0x464   :  { %1884 = vmatmul.mubr.msk.f32.vlgmr.msra.gmra.mrb[8].mxu0 %vm482_vm3, %v2252_v58 }
 0x465   :  { %1901 = vmatprep.mubr.msk.f32.mxu0 %vm482_vm3, %v2236_v42 }
 0x537   :  { %v1885_v18 = vpop.f32.mrb[8].mxu0 }
 0x538   :  { %v731_v19 = vpop.f32.mrb[9].mxu0 }
 0x539   :  { %1894 = vmatprep.mubr.msk.f32.mxu1 %vm50_vm1, %v731_v19  ;;  %v1273_v19 = vld [vmem:[#allocation2 + $0xa8] sm:$0xff] }
 0x53a   :  { %1895 = vmatmul.mubr.msk.f32.vlgmr.msra.gmra.mrb[4].mxu1 %vm50_vm1, %v1885_v18  ;;  %v1272_v18 = vld [vmem:[#allocation2 + $0xa0] sm:$0xff] }
 0x53b   :  { %1919 = vmatprep.mubr.msk.f32.mxu1 %vm482_vm3, %v2236_v42  ;;  %v1708_v42 = vld [vmem:[%s2355_s3 + $0x8] ss:$0 sm:$0xff] }
 0x60d   :  { %v1896_v20 = vpop.f32.mrb[4].mxu1 }
 0x60e   :  { %v827_v22 = vadd.f32 %v1896_v20, %v2243_v52  ;;  %v817_v23 = vpop.f32.mrb[5].mxu1 }
 0x60f   :  { %v826_v24 = vadd.f32 %v817_v23, %v2245_v53  ;;  %v1275_v23 = vld [vmem:[#allocation2 + $0xb8] sm:$0xff] }
 0x610   :  { %v834_v25 = vadd.f32 %v1703_v21, %v827_v22  ;;  %v2071_v22 = vpack.c.bf16 %v1273_v19, %v1272_v18 }
 0x611   :  { %v833_v26 = vadd.f32 %v1703_v21, %v826_v24 }
 0x612   :  { %vm836_vm8 = vcmp.ge.f32.partialorder %v834_v25, 0.0  ;;  %v838_v27 = vmul.f32 0.01, %v834_v25 }
 0x613   :  { %vm835_vm9 = vcmp.ge.f32.partialorder %v833_v26, 0.0  ;;  %v837_v28 = vmul.f32 0.01, %v833_v26 }
 0x614   :  { %v840_v32 = vsel %vm836_vm8, %v834_v25, %v838_v27  ;;  %v1505_v27 = vld [vmem:[#allocation2 + $0xc0] sm:$0xff] }
 0x615   :  { %v839_v33 = vsel %vm835_vm9, %v833_v26, %v837_v28  ;;  %v1506_v28 = vld [vmem:[#allocation2 + $0xc8] sm:$0xff] }
 0x616   :  { %v2043_v34 = vpack.c.bf16 %v840_v32, %v839_v33  ;;  %v2083_v31 = vpack.c.bf16 %v1506_v28, %v1505_v27  ;;  %v1508_v32 = vld [vmem:[#allocation2 + $0xd8] sm:$0xff] }
 0x617   :  { %v2086_v33 = vpack.c.bf16 %v1508_v32, %v1507_v30 }
 0x618   :  { %2044 = vmatprep.subr.bf16.mxu0 %v2043_v34 }
 0x619   :  { %2046 = vmatpush3.bf16.msra.mxu0 %v2043_v34 }
 0x61a   :  { %2048 = vmatprep.subr.bf16.mxu0 %v2047_v35 }
 0x61c   :  { %1902 = vmatmul.mubr.msk.f32.vlgmr.msra.gmra.mrb[10].mxu0 %vm482_vm3, %v2252_v58 }
 0x61d   :  { %2050 = vmatpush3.bf16.msra.mxu0 %v2047_v35  ;;  %v1717_v35 = vld [vmem:[%s2355_s3 + $0x3] ss:$0 sm:$0xff] }
 0x61e   :  { %2052 = vmatprep.subr.bf16.mxu0 %v2051_v38 }
 0x621   :  { %2054 = vmatpush3.bf16.msra.mxu0 %v2051_v38 }
 0x622   :  { %2067 = vmatprep.subr.bf16.mxu0 %v2154_v0 }
 0x6ef   :  { %v1903_v39 = vpop.f32.mrb[10].mxu0 }
 0x6f0   :  { %v907_v40 = vpop.f32.mrb[11].mxu0 }
 0x6f1   :  { %1912 = vmatprep.mubr.msk.f32.mxu0 %vm50_vm1, %v907_v40  ;;  %v37_v40 = vld [vmem:[%s2353_s1 + $0x28] sm:$0x1] }
 0x6f2   :  { %1913 = vmatmul.mubr.msk.f32.vlgmr.msra.gmra.mrb[12].mxu0 %vm50_vm1, %v1903_v39 }
 0x6f3   :  { %1937 = vmatprep.mubr.msk.f32.mxu0 %vm2155_vm0, %v2156_v1 }
 0x7c5   :  { %v1914_v41 = vpop.f32.mrb[12].mxu0 }
 0x7c6   :  { %v1003_v43 = vadd.f32 %v1914_v41, %v2243_v52  ;;  %v993_v44 = vpop.f32.mrb[13].mxu0 }
 0x7c7   :  { %v1002_v45 = vadd.f32 %v993_v44, %v2245_v53 }
 0x7c8   :  { %v1010_v46 = vadd.f32 %v1708_v42, %v1003_v43  ;;  %v1588_v43 = vld [vmem:[#allocation2 + $0xe8] sm:$0xff] }
 0x7c9   :  { %v1009_v47 = vadd.f32 %v1708_v42, %v1002_v45  ;;  %v1587_v42 = vld [vmem:[#allocation2 + $0xe0] sm:$0xff] }
 0x7ca   :  { %vm1012_vm10 = vcmp.ge.f32.partialorder %v1010_v46, 0.0  ;;  %v1014_v48 = vmul.f32 0.01, %v1010_v46  ;;  %v2089_v44 = vpack.c.bf16 %v1588_v43, %v1587_v42 }
 0x7cb   :  { %vm1011_vm11 = vcmp.ge.f32.partialorder %v1009_v47, 0.0  ;;  %v1013_v49 = vmul.f32 0.01, %v1009_v47 }
 0x7cc   :  { %v1016_v54 = vsel %vm1012_vm10, %v1010_v46, %v1014_v48  ;;  %v1590_v48 = vld [vmem:[#allocation2 + $0xf8] sm:$0xff] }
 0x7cd   :  { %v1015_v55 = vsel %vm1011_vm11, %v1009_v47, %v1013_v49  ;;  %v1589_v47 = vld [vmem:[#allocation2 + $0xf0] sm:$0xff] }
 0x7ce   :  { %v2055_v56 = vpack.c.bf16 %v1016_v54, %v1015_v55  ;;  %v2092_v49 = vpack.c.bf16 %v1590_v48, %v1589_v47 }
 0x7d0   :  { %2056 = vmatprep.subr.bf16.mxu1 %v2055_v56 }
 0x7d1   :  { %2058 = vmatpush3.bf16.msra.mxu1 %v2055_v56 }
 0x7d2   :  { %2060 = vmatprep.subr.bf16.mxu1 %v2059_v57 }
 0x7d4   :  { %1920 = vmatmul.mubr.msk.f32.vlgmr.msra.gmra.mrb[6].mxu1 %vm482_vm3, %v2252_v58 }
 0x7d5   :  { %2062 = vmatpush3.bf16.msra.mxu1 %v2059_v57 }
 0x7d6   :  { %2064 = vmatprep.subr.bf16.mxu1 %v2063_v61 }
 0x7d9   :  { %2066 = vmatpush3.bf16.msra.mxu1 %v2063_v61 }
 0x7da   :  { %2076 = vmatprep.subr.bf16.mxu1 %v2154_v0 }
 0x8a7   :  { %v1921_v2 = vpop.f32.mrb[6].mxu1 }
 0x8a8   :  { %v1083_v4 = vpop.f32.mrb[7].mxu1 }
 0x8a9   :  { %1930 = vmatprep.mubr.msk.f32.mxu1 %vm50_vm1, %v1083_v4 }
 0x8aa   :  { %1931 = vmatmul.mubr.msk.f32.vlgmr.msra.gmra.mrb[8].mxu1 %vm50_vm1, %v1921_v2 }
 0x8ab   :  { %2078 = vmatpush3.bf16.msra.mxu1 %v2077_v3  ;;  %1959 = vmatprep.mubr.msk.f32.mxu1 %vm2155_vm0, %v2156_v1 }
 0x8ac   :  { %2079 = vmatprep.subr.bf16.mxu1 %v2154_v0 }
 0x8af   :  { %2081 = vmatpush3.bf16.msra.mxu1 %v2080_v7 }
 0x8b0   :  { %2082 = vmatprep.subr.bf16.mxu1 %v2154_v0 }
 0x8b2   :  { %1960 = vmatmul.mubr.msk.f32.vlgmr.msra.gmra.mrb[10].mxu1 %vm50_vm1, %v2218_v29 }
 0x8b3   :  { %1975 = vmatprep.mubr.msk.f32.mxu1 %vm2155_vm0, %v2156_v1  ;;  %2084 = vmatpush3.bf16.msra.mxu1 %v2083_v31 }
 0x8b4   :  { %2085 = vmatprep.subr.bf16.mxu1 %v2154_v0 }
 0x8b7   :  { %2087 = vmatpush3.bf16.msra.mxu1 %v2086_v33 }
 0x97d   :  { %v1932_v58 = vpop.f32.mrb[8].mxu1 }
 0x97e   :  { %v1179_v9 = vadd.f32 %v1932_v58, %v2243_v52  ;;  %v1169_v10 = vpop.f32.mrb[9].mxu1  ;;  %v34_v52 = vld [vmem:[%s2353_s1 + $0x10] sm:$0xff] }
 0x97f   :  { %v1178_v11 = vadd.f32 %v1169_v10, %v2245_v53  ;;  %v1274_v53 = vld [vmem:[#allocation2 + $0xb0] sm:$0xff] }
 0x980   :  { %v1186_v12 = vadd.f32 %v1713_v8, %v1179_v9  ;;  %v2074_v24 = vpack.c.bf16 %v1275_v23, %v1274_v53 }
 0x981   :  { %v1185_v13 = vadd.f32 %v1713_v8, %v1178_v11 }
 0x982   :  { %vm1188_vm12 = vcmp.ge.f32.partialorder %v1186_v12, 0.0  ;;  %v1190_v14 = vmul.f32 0.01, %v1186_v12 }
 0x983   :  { %vm1187_vm13 = vcmp.ge.f32.partialorder %v1185_v13, 0.0  ;;  %v1189_v15 = vmul.f32 0.01, %v1185_v13 }
 0x984   :  { %v1192_v29 = vsel %vm1188_vm12, %v1186_v12, %v1190_v14 }
 0x985   :  { %v1191_v16 = vsel %vm1187_vm13, %v1185_v13, %v1189_v15  ;;  %v1418_v17 = vpop.f32.mrb[10].mxu1 }
 0x986   :  { %v1961_v20 = vpop.f32.mrb[11].mxu1  ;;  %v2068_v21 = vpack.c.bf16 %v1192_v29, %v1191_v16 }
 0x988   :  { %2069 = vmatpush3.bf16.msra.mxu0 %v2068_v21 }
 0x989   :  { %2070 = vmatprep.subr.bf16.mxu0 %v2154_v0 }
 0x98b   :  { %1938 = vmatmul.mubr.msk.f32.vlgmr.msra.gmra.mrb[14].mxu0 %vm482_vm3, %v34_v52 }
 0x98c   :  { %2072 = vmatpush3.bf16.msra.mxu0 %v2071_v22  ;;  %1948 = vmatprep.mubr.msk.f32.mxu0 %vm2155_vm0, %v2156_v1 }
 0x98d   :  { %2073 = vmatprep.subr.bf16.mxu0 %v2154_v0 }
 0x990   :  { %2075 = vmatpush3.bf16.msra.mxu0 %v2074_v24 }
 0x991   :  { %1962 = vmatprep.subr.mxu0 %v2156_v1 }
 0xa5e   :  { %v1262_v25 = vpop.f32.mrb[14].mxu0 }
 0xa5f   :  { %v1939_v26 = vpop.f32.mrb[15].mxu0  ;;  %1949 = vmatmul.mubr.msk.f32.vlgmr.msra.gmra.mrb[16].mxu0 %vm50_vm1, %v1262_v25 }
 0xa60   :  { %1964 = vmatprep.mubr.msk.f32.mxu0 %vm2155_vm0, %v2156_v1 }
 0xb32   :  { %v1345_v34 = vpop.f32.mrb[16].mxu0 }
 0xb33   :  { %v1419_v36 = vadd.f32 %v1418_v17, %v1345_v34  ;;  %v1950_v37 = vpop.f32.mrb[17].mxu0 }
 0xb35   :  { %v1427_v38 = vadd.f32 %v1717_v35, %v1419_v36 }
 0xb37   :  { %v1429_v39 = vmul.f32 0.01, %v1427_v38  ;;  %vm1428_vm14 = vcmp.ge.f32.partialorder %v1427_v38, 0.0 }
 0xb39   :  { %v1430_v41 = vsel %vm1428_vm14, %v1427_v38, %v1429_v39 }
 0xb3a   :  { %1963 = vmatpush3.msra.mxu0 %v1430_v41 }
 0xb3b   :  { %1965 = vmatmul.mubr.msk.f32.vlgmr.msra.gmra.mrb[18].mxu0 %vm215_vm2, %v37_v40  ;;  %2088 = vmatprep.subr.bf16.mxu0 %v2154_v0 }
 0xb3c   :  { %1986 = vmatprep.mubr.msk.f32.mxu0 %vm2155_vm0, %v2156_v1  ;;  %2090 = vmatpush3.bf16.msra.mxu0 %v2089_v44  ;;  %vm1665_vm0 = vcmask 253952  }
 0xb3d   :  { %2091 = vmatprep.subr.bf16.mxu0 %v2154_v0  ;;  %v1591_v0 = vld [vmem:[%s2355_s3 + $0x5] sm:$0x1] }
 0xb40   :  { %2093 = vmatpush3.bf16.msra.mxu0 %v2092_v49 }
 0xc0e   :  { %v1500_v45 = vpop.f32.mrb[18].mxu0 }
 0xc0f   :  { %1976 = vmatmul.mubr.msk.f32.vlgmr.msra.gmra.mrb[12].mxu1 %vm50_vm1, %v1500_v45  ;;  %v1966_v46 = vpop.f32.mrb[19].mxu0 }
 0xce2   :  { %v1579_v51 = vpop.f32.mrb[12].mxu1 }
 0xce3   :  { %v1580_v1 = vadd.f32 %v1579_v51, %v1509_v50  ;;  %v1977_v54 = vpop.f32.mrb[13].mxu1 }
 0xce5   :  { %vm1583_vm15 = vcmp.ge.f32.partialorder %v1580_v1, 0.0  ;;  %v1584_v55 = vmul.f32 0.01, %v1580_v1 }
 0xce7   :  { %v1585_v56 = vsel %vm1583_vm15, %v1580_v1, %v1584_v55 }
 0xce8   :  { %1987 = vmatmul.mubr.msk.f32.vlgmr.msra.gmra.mrb[20].mxu0 %vm50_vm1, %v1585_v56 }
 0xdbb   :  { %v1661_v57 = vpop.f32.mrb[20].mxu0 }
 0xdbc   :  { %v1662_v59 = vadd.f32 %v1661_v57, %v1591_v0  ;;  %v1988_v60 = vpop.f32.mrb[21].mxu0 }
 0xdbe   :  { %1666 = vst.msk [vmem:[#allocation5] sm:$0x1] %vm1665_vm0, %v1662_v59 }
 0xdbf   :  { %2136 = shalt.err (!%p2133_p12)
}
 0xdc0   :  { %s2137_s3 = scalar_lea.hbm %s2356_s4, 16 }
 0xdc1   :  { %p2138_p13 = scmp.ne.s32.totalorder %s2356_s4, %s2137_s3  ;;  %p2141_p0 = scmp.lt.u32.totalorder %s2137_s3, %s2356_s4 }
 0xdc3   :  { %p2143_p1 = pnand %p2141_p0, %p2138_p13 }
 0xdc5   :  { %2146 = shalt.err (!%p2143_p1)
}
 0xdc6   :  { %1676 = dma.vmem_to_hbm [thread:$0]  %s1674_s11, 16, %s2356_s4, [#allocation4]  }
 0xdc7   :  { %2149 = dma.done.wait [#allocation4], 16  }
 0xdc8   :  { %2150 = vsyncadd [#allocation4], 4294967280 }
 0xdc9   :  { %1680 = vsyncpa [#allocation3], 1 }
 0xdca   :  { %1681 = vsyncpa [#allocation4], 1 }

</bundles_post_ra>
